<compile_context>
chip_gen: v6e
topology: v6e:2x2x1
jax: 0.10.0
libtpu: 0.0.40
codegen_flags: <defaults>
</compile_context>

<pallas_src>
import functools

import jax
import jax.numpy as jnp
import numpy as np
from jax.experimental import pallas as pl
from jax.experimental.pallas import tpu as pltpu


def down_kernel(xph_ref, w_ref, o_ref, *, h_out, w_out, c_in, eps,
                alt_leak, neg_slope):
    # xph_ref: (B_TILE, Hp2, Wp2, 4*C_in)  stride-2 phase split of padded input
    #          minor index = ((kh % 2) * 2 + (kw % 2)) * C_in + ci
    # w_ref:   (9*C_in, C_pad)             tap-major, lane-padded C_out
    # o_ref:   (B_TILE, P, C_pad)          P = h_out * w_out, lane-dense output
    b = xph_ref.shape[0]
    c_pad = o_ref.shape[-1]
    p = h_out * w_out

    # ---- in-VMEM im2col: assemble (B_TILE*P, 9*C_in) from static tap slices ----
    taps = []
    for kh in range(3):
        for kw in range(3):
            phase = (kh % 2) * 2 + (kw % 2)
            dh, dw = kh // 2, kw // 2
            tap = xph_ref[:, dh:dh + h_out, dw:dw + w_out,
                          phase * c_in:(phase + 1) * c_in]      # (b, h_out, w_out, c_in)
            taps.append(tap.reshape(b * p, c_in))
    lhs = jnp.concatenate(taps, axis=-1)                         # (b*p, 9*c_in)

    # ---- convolution: single fused MXU matmul, f32 accumulation ----
    acc = jnp.dot(lhs, w_ref[...], preferred_element_type=jnp.float32)
    acc = acc.reshape(b, p, c_pad)
    # NOTE: conv bias intentionally omitted — it cancels under InstanceNorm.

    # ---- InstanceNorm2d(affine=False, eps), two-pass, f32 ----
    inv_p = 1.0 / float(p)
    mean = jnp.sum(acc, axis=1, keepdims=True) * inv_p           # (b, 1, c_pad)
    cen = acc - mean
    var = jnp.sum(cen * cen, axis=1, keepdims=True) * inv_p
    y = cen * jax.lax.rsqrt(var + eps)

    # ---- activation + lane-dense store ----
    if alt_leak:
        y = jnp.where(y >= 0.0, y, neg_slope * y)
    else:
        y = jnp.maximum(y, 0.0)
    o_ref[...] = y.astype(o_ref.dtype)


def _vmem_bytes(shape, dtype):
    """Rough VMEM footprint of one buffer with (sublane, lane) tiling padding."""
    item = jnp.dtype(dtype).itemsize
    dims = list(shape)
    dims[-1] = -(-dims[-1] // 128) * 128
    if len(dims) >= 2:
        sub = 8 * max(1, 4 // item)
        dims[-2] = -(-dims[-2] // sub) * sub
    total = item
    for d in dims:
        total *= int(d)
    return total


def down_pallas(x_nchw, weight, bias=None, *, use_bf16=True,
                out_dtype=jnp.float32, nhwc_out=False, batch_tile=8,
                eps=1e-5, alt_leak=False, neg_slope=0.01):
    """x_nchw: (N, C_in, H, W); weight: (C_out, C_in, 3, 3); bias ignored
    (a per-channel constant is a no-op under InstanceNorm(affine=False))."""
    del bias
    N, C_in, H, W = x_nchw.shape
    C_out = weight.shape[0]
    H_out = (H + 2 - 3) // 2 + 1
    W_out = (W + 2 - 3) // 2 + 1
    P = H_out * W_out
    C_pad = ((C_out + 127) // 128) * 128

    # ---- glue: pad to even extents, stride-2 space-to-depth phase split ----
    Hp = (H + 2) + ((H + 2) % 2)
    Wp = (W + 2) + ((W + 2) % 2)
    xp = jnp.pad(x_nchw, ((0, 0), (0, 0), (1, Hp - H - 1), (1, Wp - W - 1)))
    Hp2, Wp2 = Hp // 2, Wp // 2
    # (N,C,Hp,Wp) -> (N,C,Hp2,2,Wp2,2) -> (N,Hp2,Wp2,ph,pw,C) -> (N,Hp2,Wp2,4*C)
    xph = jnp.transpose(xp.reshape(N, C_in, Hp2, 2, Wp2, 2), (0, 2, 4, 3, 5, 1))
    xph = xph.reshape(N, Hp2, Wp2, 4 * C_in)

    # weight (C_out, C_in, 3, 3) -> (kh, kw, C_in, C_out) -> (9*C_in, C_pad)
    w9 = jnp.transpose(weight, (2, 3, 1, 0)).reshape(9 * C_in, C_out)
    w9 = jnp.pad(w9, ((0, 0), (0, C_pad - C_out)))

    dt = jnp.bfloat16 if use_bf16 else jnp.float32
    xph = xph.astype(dt)
    w9 = w9.astype(dt)

    # ---- batch tiling: several images per grid step for small images ----
    B_TILE = max(1, min(batch_tile, N))
    N_pad = -(-N // B_TILE) * B_TILE
    if N_pad != N:
        xph = jnp.pad(xph, ((0, N_pad - N), (0, 0), (0, 0), (0, 0)))

    kernel = functools.partial(down_kernel, h_out=H_out, w_out=W_out,
                               c_in=C_in, eps=eps, alt_leak=alt_leak,
                               neg_slope=neg_slope)

    # ---- scoped-VMEM budget: 2x double-buffered blocks + intermediates ----
    in_blk = _vmem_bytes((B_TILE, Hp2, Wp2, 4 * C_in), dt)
    w_blk = _vmem_bytes((9 * C_in, C_pad), dt)
    out_blk = _vmem_bytes((B_TILE, P, C_pad), out_dtype)
    interm = _vmem_bytes((B_TILE * P, 9 * C_in), dt) \
        + 4 * _vmem_bytes((B_TILE * P, C_pad), jnp.float32)
    vmem_limit = 2 * (in_blk + w_blk + out_blk) + interm + (2 << 20)
    vmem_limit = int(min(max(vmem_limit, 32 << 20), 64 << 20))

    out = pl.pallas_call(
        kernel,
        out_shape=jax.ShapeDtypeStruct((N_pad, P, C_pad), out_dtype),
        grid=(N_pad // B_TILE,),
        in_specs=[
            pl.BlockSpec((B_TILE, Hp2, Wp2, 4 * C_in), lambda n: (n, 0, 0, 0)),
            pl.BlockSpec((9 * C_in, C_pad), lambda n: (0, 0)),
        ],
        out_specs=pl.BlockSpec((B_TILE, P, C_pad), lambda n: (n, 0, 0)),
        compiler_params=pltpu.CompilerParams(
            dimension_semantics=("parallel",),
            vmem_limit_bytes=vmem_limit),
    )(xph, w9)

    out = out[:N, :, :C_out].reshape(N, H_out, W_out, C_out)
    if nhwc_out:
        # Transpose-free path for NHWC consumers (saves an HBM round trip).
        return out
    return jnp.transpose(out, (0, 3, 1, 2))


def down_reference(x_nchw, weight, bias):
    """Pure-JAX reference mirroring the PyTorch module (bias included)."""
    y = jax.lax.conv_general_dilated(
        x_nchw, weight, window_strides=(2, 2), padding=((1, 1), (1, 1)),
        dimension_numbers=("NCHW", "OIHW", "NCHW"))
    y = y + bias.reshape(1, -1, 1, 1)
    mean = jnp.mean(y, axis=(2, 3), keepdims=True)
    var = jnp.mean((y - mean) ** 2, axis=(2, 3), keepdims=True)
    y = (y - mean) * jax.lax.rsqrt(var + 1e-5)
    return jnp.maximum(y, 0.0)


if __name__ == "__main__":
    key = jax.random.PRNGKey(0)
    k_x, k_w, k_b = jax.random.split(key, 3)

    N, C_in, C_out, H, W = 2, 4, 8, 16, 16
    x = jax.random.normal(k_x, (N, C_in, H, W), dtype=jnp.float32)
    weight = 0.1 * jax.random.normal(k_w, (C_out, C_in, 3, 3), dtype=jnp.float32)
    bias = 0.1 * jax.random.normal(k_b, (C_out,), dtype=jnp.float32)

    ref = jax.block_until_ready(down_reference(x, weight, bias))

    # f32-operand path (tight tolerance): bias is dropped in the kernel but the
    # reference keeps it — matching results proves the InstanceNorm cancellation.
    out_f32 = jax.block_until_ready(down_pallas(x, weight, bias, use_bf16=False))
    assert out_f32.shape == (N, C_out, H // 2, W // 2), out_f32.shape
    np.testing.assert_allclose(np.asarray(out_f32), np.asarray(ref),
                               rtol=1e-4, atol=1e-4)

    # Default bf16-operand MXU path (all generations incl. v5e), looser tolerance.
    out_bf16 = jax.block_until_ready(down_pallas(x, weight, bias))
    np.testing.assert_allclose(np.asarray(out_bf16), np.asarray(ref),
                               rtol=5e-2, atol=5e-2)

    # Reduced-writeback path: bf16 output, NHWC (no NCHW transpose round trip).
    out_nhwc = jax.block_until_ready(
        down_pallas(x, weight, bias, out_dtype=jnp.bfloat16, nhwc_out=True))
    ref_nhwc = jnp.transpose(ref, (0, 2, 3, 1))
    np.testing.assert_allclose(np.asarray(out_nhwc, dtype=np.float32),
                               np.asarray(ref_nhwc), rtol=5e-2, atol=5e-2)

    print("KERNEL_OK")
</pallas_src>

<mosaic_0001>
module attributes {stable_mosaic.version = 11 : i64} {
  func.func @down_kernel(%arg0: i32, %arg1: memref<2x9x9x16xf32, #tpu.memory_space<vmem>>, %arg2: memref<36x128xf32, #tpu.memory_space<vmem>>, %arg3: memref<2x64x128xf32, #tpu.memory_space<vmem>>) attributes {dimension_semantics = [#tpu.dimension_semantics<parallel>], iteration_bounds = array<i64: 1>, scalar_prefetch = 0 : i64, scratch_operands = 0 : i64, tpu.core_type = #tpu.core_type<tc>, window_params = [{transform_indices = @transform_0, window_bounds = array<i64: 2, 9, 9, 16>}, {pipeline_mode = #tpu.pipeline_mode<synchronous>, transform_indices = @transform_1, window_bounds = array<i64: 36, 128>}, {transform_indices = @transform_2, window_bounds = array<i64: 2, 64, 128>}]} {
    %c0 = arith.constant 0 : index
    %c0_0 = arith.constant 0 : index
    %c0_1 = arith.constant 0 : index
    %c0_2 = arith.constant 0 : index
    %0 = vector.load %arg1[%c0, %c0_0, %c0_1, %c0_2] : memref<2x9x9x16xf32, #tpu.memory_space<vmem>>, vector<2x8x8x4xf32>
    %1 = vector.shape_cast %0 : vector<2x8x8x4xf32> to vector<128x4xf32>
    %c0_3 = arith.constant 0 : index
    %c0_4 = arith.constant 0 : index
    %c0_5 = arith.constant 0 : index
    %c4 = arith.constant 4 : index
    %2 = vector.load %arg1[%c0_3, %c0_4, %c0_5, %c4] : memref<2x9x9x16xf32, #tpu.memory_space<vmem>>, vector<2x8x8x4xf32>
    %3 = vector.shape_cast %2 : vector<2x8x8x4xf32> to vector<128x4xf32>
    %c0_6 = arith.constant 0 : index
    %c0_7 = arith.constant 0 : index
    %c1 = arith.constant 1 : index
    %c0_8 = arith.constant 0 : index
    %4 = vector.load %arg1[%c0_6, %c0_7, %c1, %c0_8] : memref<2x9x9x16xf32, #tpu.memory_space<vmem>>, vector<2x8x8x4xf32>
    %5 = vector.shape_cast %4 : vector<2x8x8x4xf32> to vector<128x4xf32>
    %c0_9 = arith.constant 0 : index
    %c0_10 = arith.constant 0 : index
    %c0_11 = arith.constant 0 : index
    %c8 = arith.constant 8 : index
    %6 = vector.load %arg1[%c0_9, %c0_10, %c0_11, %c8] : memref<2x9x9x16xf32, #tpu.memory_space<vmem>>, vector<2x8x8x4xf32>
    %7 = vector.shape_cast %6 : vector<2x8x8x4xf32> to vector<128x4xf32>
    %c0_12 = arith.constant 0 : index
    %c0_13 = arith.constant 0 : index
    %c0_14 = arith.constant 0 : index
    %c12 = arith.constant 12 : index
    %8 = vector.load %arg1[%c0_12, %c0_13, %c0_14, %c12] : memref<2x9x9x16xf32, #tpu.memory_space<vmem>>, vector<2x8x8x4xf32>
    %9 = vector.shape_cast %8 : vector<2x8x8x4xf32> to vector<128x4xf32>
    %c0_15 = arith.constant 0 : index
    %c0_16 = arith.constant 0 : index
    %c1_17 = arith.constant 1 : index
    %c8_18 = arith.constant 8 : index
    %10 = vector.load %arg1[%c0_15, %c0_16, %c1_17, %c8_18] : memref<2x9x9x16xf32, #tpu.memory_space<vmem>>, vector<2x8x8x4xf32>
    %11 = vector.shape_cast %10 : vector<2x8x8x4xf32> to vector<128x4xf32>
    %c0_19 = arith.constant 0 : index
    %c1_20 = arith.constant 1 : index
    %c0_21 = arith.constant 0 : index
    %c0_22 = arith.constant 0 : index
    %12 = vector.load %arg1[%c0_19, %c1_20, %c0_21, %c0_22] : memref<2x9x9x16xf32, #tpu.memory_space<vmem>>, vector<2x8x8x4xf32>
    %13 = vector.shape_cast %12 : vector<2x8x8x4xf32> to vector<128x4xf32>
    %c0_23 = arith.constant 0 : index
    %c1_24 = arith.constant 1 : index
    %c0_25 = arith.constant 0 : index
    %c4_26 = arith.constant 4 : index
    %14 = vector.load %arg1[%c0_23, %c1_24, %c0_25, %c4_26] : memref<2x9x9x16xf32, #tpu.memory_space<vmem>>, vector<2x8x8x4xf32>
    %15 = vector.shape_cast %14 : vector<2x8x8x4xf32> to vector<128x4xf32>
    %c0_27 = arith.constant 0 : index
    %c1_28 = arith.constant 1 : index
    %c1_29 = arith.constant 1 : index
    %c0_30 = arith.constant 0 : index
    %16 = vector.load %arg1[%c0_27, %c1_28, %c1_29, %c0_30] : memref<2x9x9x16xf32, #tpu.memory_space<vmem>>, vector<2x8x8x4xf32>
    %17 = vector.shape_cast %16 : vector<2x8x8x4xf32> to vector<128x4xf32>
    %18 = tpu.concatenate %1, %3, %5, %7, %9, %11, %13, %15, %17 in 1 : vector<128x4xf32>, vector<128x4xf32>, vector<128x4xf32>, vector<128x4xf32>, vector<128x4xf32>, vector<128x4xf32>, vector<128x4xf32>, vector<128x4xf32>, vector<128x4xf32> -> vector<128x36xf32>
    %c0_31 = arith.constant 0 : index
    %c0_32 = arith.constant 0 : index
    %19 = vector.load %arg2[%c0_31, %c0_32] : memref<36x128xf32, #tpu.memory_space<vmem>>, vector<36x128xf32>
    %cst = arith.constant dense<0.000000e+00> : vector<128x128xf32>
    %20 = tpu.matmul %18, %19, %cst {dimension_numbers = #tpu.dot_dimension_numbers<[1], [0], [0], [1], [0, 0, 1, 1], [], []>} : vector<128x36xf32>, vector<36x128xf32>, vector<128x128xf32> -> vector<128x128xf32>
    %21 = vector.shape_cast %20 : vector<128x128xf32> to vector<2x64x128xf32>
    %cst_33 = arith.constant dense<0.000000e+00> : vector<2x128xf32>
    %22 = vector.multi_reduction <add>, %21, %cst_33 [1] : vector<2x64x128xf32> to vector<2x128xf32>
    %23 = vector.shape_cast %22 : vector<2x128xf32> to vector<2x1x128xf32>
    %cst_34 = arith.constant 1.562500e-02 : f32
    %24 = vector.broadcast %cst_34 : f32 to vector<2x1x128xf32>
    %25 = arith.mulf %23, %24 : vector<2x1x128xf32>
    %26 = vector.broadcast %25 : vector<2x1x128xf32> to vector<2x64x128xf32>
    %27 = arith.subf %21, %26 : vector<2x64x128xf32>
    %28 = arith.mulf %27, %27 : vector<2x64x128xf32>
    %cst_35 = arith.constant dense<0.000000e+00> : vector<2x128xf32>
    %29 = vector.multi_reduction <add>, %28, %cst_35 [1] : vector<2x64x128xf32> to vector<2x128xf32>
    %30 = vector.shape_cast %29 : vector<2x128xf32> to vector<2x1x128xf32>
    %cst_36 = arith.constant 1.562500e-02 : f32
    %31 = vector.broadcast %cst_36 : f32 to vector<2x1x128xf32>
    %32 = arith.mulf %30, %31 : vector<2x1x128xf32>
    %cst_37 = arith.constant 9.99999974E-6 : f32
    %33 = vector.broadcast %cst_37 : f32 to vector<2x1x128xf32>
    %34 = arith.addf %32, %33 : vector<2x1x128xf32>
    %35 = math.rsqrt %34 : vector<2x1x128xf32>
    %36 = vector.broadcast %35 : vector<2x1x128xf32> to vector<2x64x128xf32>
    %37 = arith.mulf %27, %36 : vector<2x64x128xf32>
    %cst_38 = arith.constant 0.000000e+00 : f32
    %38 = vector.broadcast %cst_38 : f32 to vector<2x64x128xf32>
    %39 = arith.maximumf %37, %38 : vector<2x64x128xf32>
    %c0_39 = arith.constant 0 : index
    %c0_40 = arith.constant 0 : index
    %c0_41 = arith.constant 0 : index
    %40 = vector.load %arg3[%c0_39, %c0_40, %c0_41] : memref<2x64x128xf32, #tpu.memory_space<vmem>>, vector<2x64x128xf32>
    tpu.vector_store %arg3[%c0_39, %c0_40, %c0_41], %39 {strides = array<i32>} : memref<2x64x128xf32, #tpu.memory_space<vmem>>, vector<2x64x128xf32>,
    return
  }
  func.func @transform_0(%arg0: i32) -> (i32, i32, i32, i32) {
    %c0_i32 = arith.constant 0 : i32
    %c0_i32_0 = arith.constant 0 : i32
    %c0_i32_1 = arith.constant 0 : i32
    %c0_i32_2 = arith.constant 0 : i32
    return %arg0, %c0_i32, %c0_i32_0, %c0_i32_1 : i32, i32, i32, i32
  }
  func.func @transform_1(%arg0: i32) -> (i32, i32) {
    %c0_i32 = arith.constant 0 : i32
    %c0_i32_0 = arith.constant 0 : i32
    %c0_i32_1 = arith.constant 0 : i32
    return %c0_i32, %c0_i32_0 : i32, i32
  }
  func.func @transform_2(%arg0: i32) -> (i32, i32, i32) {
    %c0_i32 = arith.constant 0 : i32
    %c0_i32_0 = arith.constant 0 : i32
    %c0_i32_1 = arith.constant 0 : i32
    return %arg0, %c0_i32, %c0_i32_0 : i32, i32, i32
  }
}

</mosaic_0001>

<bundles_post_ra>
// kernel: tpu_custom_call.1
= control target key start
LH: loop header
LB: loop body
LE: loop exit
PB: predicated region body
PF: predicated region fallthrough
CT: control target
= control target key end

     0   :  { %s1006_s13 = smov 8   ;;  %s1007_s22 = smov 4   ;;  %s1583_s0 = inlined_call_operand.vmem [shape: f32[2,9,9,16], index: 0, kind: input, shape index: {}]   ;;  %s1584_s1 = inlined_call_operand.vmem [shape: f32[36,128], index: 1, kind: input, shape index: {}]   ;;  %s1585_s2 = inlined_call_operand.hbm [shape: f32[2,64,128], index: 2, kind: output, shape index: {}]  }
   0x1   :  { %v1031_v0 = vld [vmem:[%s1583_s0 + $0x11] sm:$0xff]  ;;  %v28_v1 = vld [vmem:[%s1583_s0 + $0x1] sm:$0xff] }
   0x2   :  { %95 = vrot.lane.b32.xlu1 %v1031_v0, %s1006_s13  ;;  %93 = vrot.lane.b32.xlu0 %v28_v1, %s1006_s13  ;;  %v1042_v2 = vld [vmem:[%s1583_s0 + $0xa1] sm:$0xff]  ;;  %v36_v3 = vld [vmem:[%s1583_s0 + $0x91] sm:$0xff] }
   0x3   :  { %v1053_v4 = vld [vmem:[%s1583_s0 + $0x90] sm:$0xff]  ;;  %v1058_v5 = vld [vmem:[%s1583_s0] sm:$0xff] }
   0x4   :  { %v1067_v6 = vld [vmem:[%s1583_s0 + $0xa0] sm:$0xff]  ;;  %v1072_v7 = vld [vmem:[%s1583_s0 + $0x10] sm:$0xff] }
   0x6   :  { %111 = vrot.lane.b32.xlu1 %v1042_v2, %s1006_s13  ;;  %109 = vrot.lane.b32.xlu0 %v36_v3, %s1006_s13 }
   0xa   :  { %173 = vrot.lane.b32.xlu1 %v1053_v4, %s1007_s22  ;;  %157 = vrot.lane.b32.xlu0 %v1058_v5, %s1007_s22 }
   0xb   :  { %7 = vsyncpa [#allocation3], 0  ;;  %s1008_s27 = smov 12   ;;  %v38_v8 = vld [vmem:[%s1583_s0 + $0xb1] sm:$0xff]  ;;  %v30_v9 = vld [vmem:[%s1583_s0 + $0x21] sm:$0xff]  ;;  %s1009_s4 = smov 24  }
   0xc   :  { %v1099_v10 = vld [vmem:[%s1583_s0 + $0xc1] sm:$0xff]  ;;  %v1104_v11 = vld [vmem:[%s1583_s0 + $0x31] sm:$0xff]  ;;  %vm554_vm0 = vcmask 1043456   ;;  %vm381_vm1 = vcmask 64512   ;;  %vm398_vm2 = vcmask 97280   ;;  %vm415_vm3 = vcmask 130048  }
   0xd   :  { %v504_v12 = vld [vmem:[%s1584_s1 + $0x20] sm:$0xf]  ;;  %v1116_v13 = vld [vmem:[%s1583_s0 + $0xb0] sm:$0xff]  ;;  %v503_v15 = vld [vmem:[%s1584_s1 + $0x18] sm:$0xff]  ;;  %vm432_vm4 = vcmask 162816   ;;  %vm449_vm5 = vcmask 195584  }
   0xe   :  { %175 = vrot.lane.b32.xlu1 %v1067_v6, %s1007_s22  ;;  %159 = vrot.lane.b32.xlu0 %v1072_v7, %s1007_s22  ;;  %v1121_v14 = vld [vmem:[%s1583_s0 + $0x20] sm:$0xff]  ;;  %v502_v16 = vld [vmem:[%s1584_s1 + $0x10] sm:$0xff]  ;;  %vm466_vm6 = vcmask 228352   ;;  %vm483_vm7 = vcmask 261120   ;;  %vm505_vm8 = vcmask 293888  }
   0xf   :  { %929 = vmatprep.subr.msk.mxu0 %vm554_vm0, %v504_v12  ;;  %963 = vmatprep.subr.msk.mxu1 %vm554_vm0, %v504_v12  ;;  %v501_v17 = vld [vmem:[%s1584_s1 + $0x8] sm:$0xff]  ;;  %v500_v18 = vld [vmem:[%s1584_s1] sm:$0xff]  ;;  %v1151_v20 = vld [vmem:[%s1583_s0 + $0x30] sm:$0xff]  ;;  %s1010_s1 = smov 32  }
  0x10   :  { %930 = vmatpush3.msk.msra.mxu0 %vm554_vm0, %v504_v12  ;;  %968 = vmatpush3.msk.msra.mxu1 %vm554_vm0, %v504_v12  ;;  %v1146_v19 = vld [vmem:[%s1583_s0 + $0xc0] sm:$0xff]  ;;  %v40_v21 = vld [vmem:[%s1583_s0 + $0xd1] sm:$0xff] }
  0x11   :  { %931 = vmatprep.subr.mxu0 %v503_v15  ;;  %964 = vmatprep.subr.mxu1 %v503_v15  ;;  %v32_v22 = vld [vmem:[%s1583_s0 + $0x41] sm:$0xff]  ;;  %v33_v24 = vld [vmem:[%s1583_s0 + $0x51] sm:$0xff] }
  0x12   :  { %221 = vrot.lane.b32.xlu1 %v36_v3, %s1008_s27  ;;  %205 = vrot.lane.b32.xlu0 %v28_v1, %s1008_s27  ;;  %v41_v23 = vld [vmem:[%s1583_s0 + $0xe1] sm:$0xff]  ;;  %v1192_v25 = vld [vmem:[%s1583_s0 + $0xd0] sm:$0xff] }
  0x13   :  { %932 = vmatpush3.msra.mxu0 %v503_v15  ;;  %969 = vmatpush3.msra.mxu1 %v503_v15  ;;  %v1197_v26 = vld [vmem:[%s1583_s0 + $0x40] sm:$0xff]  ;;  %v1215_v28 = vld [vmem:[%s1583_s0 + $0x50] sm:$0xff] }
  0x14   :  { %933 = vmatprep.subr.mxu0 %v502_v16  ;;  %965 = vmatprep.subr.mxu1 %v502_v16  ;;  %v1210_v27 = vld [vmem:[%s1583_s0 + $0xe0] sm:$0xff]  ;;  %v42_v29 = vld [vmem:[%s1583_s0 + $0xf1] sm:$0xff] }
  0x15   :  { %934 = vmatpush3.msra.mxu0 %v502_v16  ;;  %970 = vmatpush3.msra.mxu1 %v502_v16  ;;  %v34_v30 = vld [vmem:[%s1583_s0 + $0x61] sm:$0xff]  ;;  %v35_v32 = vld [vmem:[%s1583_s0 + $0x71] sm:$0xff] }
  0x16   :  { %113 = vrot.lane.b32.xlu1 %v38_v8, %s1006_s13  ;;  %97 = vrot.lane.b32.xlu0 %v30_v9, %s1006_s13  ;;  %v43_v31 = vld [vmem:[%s1583_s0 + $0x101] sm:$0xff]  ;;  %v1254_v33 = vld [vmem:[%s1583_s0 + $0xf0] sm:$0xff] }
  0x17   :  { %935 = vmatprep.subr.mxu0 %v501_v17  ;;  %966 = vmatprep.subr.mxu1 %v501_v17  ;;  %v1259_v34 = vld [vmem:[%s1583_s0 + $0x60] sm:$0xff]  ;;  %v1281_v40 = vld [vmem:[%s1583_s0 + $0x70] sm:$0xff] }
  0x18   :  { %936 = vmatpush3.msra.mxu0 %v501_v17  ;;  %971 = vmatpush3.msra.mxu1 %v501_v17  ;;  %v1276_v39 = vld [vmem:[%s1583_s0 + $0x100] sm:$0xff]  ;;  %v874_v53 = vld [vmem:[%s1583_s0 + $0x110] sm:$0xff] }
  0x19   :  { %937 = vmatprep.subr.mxu0 %v500_v18  ;;  %967 = vmatprep.subr.mxu1 %v500_v18  ;;  %v866_v54 = vld [vmem:[%s1583_s0 + $0x80] sm:$0xff]  ;;  %v890_v61 = vld [vmem:[%s1583_s0 + $0x111] sm:$0xff] }
  0x1a   :  { %223 = vrot.lane.b32.xlu1 %v1042_v2, %s1008_s27  ;;  %207 = vrot.lane.b32.xlu0 %v1031_v0, %s1008_s27  ;;  %v882_v62 = vld [vmem:[%s1583_s0 + $0x81] sm:$0xff]  ;;  %s1011_s0 = smov [#allocation2]  }
  0x1b   :  { %938 = vmatpush3.msra.mxu0 %v500_v18  ;;  %972 = vmatpush3.msra.mxu1 %v500_v18 }
  0x1e   :  { %285 = vrot.lane.b32.xlu1 %v1067_v6, %s1009_s4  ;;  %269 = vrot.lane.b32.xlu0 %v1072_v7, %s1009_s4 }
  0x22   :  { %115 = vrot.lane.b32.xlu1 %v1099_v10, %s1006_s13  ;;  %99 = vrot.lane.b32.xlu0 %v1104_v11, %s1006_s13 }
  0x26   :  { %177 = vrot.lane.b32.xlu1 %v1116_v13, %s1007_s22  ;;  %161 = vrot.lane.b32.xlu0 %v1121_v14, %s1007_s22 }
  0x2a   :  { %287 = vrot.lane.b32.xlu1 %v1116_v13, %s1009_s4  ;;  %271 = vrot.lane.b32.xlu0 %v1121_v14, %s1009_s4 }
  0x2e   :  { %179 = vrot.lane.b32.xlu1 %v1146_v19, %s1007_s22  ;;  %163 = vrot.lane.b32.xlu0 %v1151_v20, %s1007_s22 }
  0x32   :  { %349 = vrot.lane.b32.xlu1 %v1042_v2, %s1010_s1  ;;  %333 = vrot.lane.b32.xlu0 %v1031_v0, %s1010_s1 }
  0x36   :  { %225 = vrot.lane.b32.xlu1 %v38_v8, %s1008_s27  ;;  %209 = vrot.lane.b32.xlu0 %v30_v9, %s1008_s27 }
  0x3a   :  { %351 = vrot.lane.b32.xlu1 %v38_v8, %s1010_s1  ;;  %335 = vrot.lane.b32.xlu0 %v30_v9, %s1010_s1 }
  0x3e   :  { %117 = vrot.lane.b32.xlu1 %v40_v21, %s1006_s13  ;;  %101 = vrot.lane.b32.xlu0 %v32_v22, %s1006_s13 }
  0x42   :  { %227 = vrot.lane.b32.xlu1 %v1099_v10, %s1008_s27  ;;  %211 = vrot.lane.b32.xlu0 %v1104_v11, %s1008_s27 }
  0x46   :  { %289 = vrot.lane.b32.xlu1 %v1146_v19, %s1009_s4  ;;  %273 = vrot.lane.b32.xlu0 %v1151_v20, %s1009_s4 }
  0x4a   :  { %119 = vrot.lane.b32.xlu1 %v41_v23, %s1006_s13  ;;  %103 = vrot.lane.b32.xlu0 %v33_v24, %s1006_s13 }
  0x4e   :  { %181 = vrot.lane.b32.xlu1 %v1192_v25, %s1007_s22  ;;  %165 = vrot.lane.b32.xlu0 %v1197_v26, %s1007_s22 }
  0x52   :  { %291 = vrot.lane.b32.xlu1 %v1192_v25, %s1009_s4  ;;  %275 = vrot.lane.b32.xlu0 %v1197_v26, %s1009_s4 }
  0x56   :  { %183 = vrot.lane.b32.xlu1 %v1210_v27, %s1007_s22  ;;  %167 = vrot.lane.b32.xlu0 %v1215_v28, %s1007_s22 }
  0x5a   :  { %353 = vrot.lane.b32.xlu1 %v1099_v10, %s1010_s1  ;;  %337 = vrot.lane.b32.xlu0 %v1104_v11, %s1010_s1 }
  0x5e   :  { %229 = vrot.lane.b32.xlu1 %v40_v21, %s1008_s27  ;;  %213 = vrot.lane.b32.xlu0 %v32_v22, %s1008_s27 }
  0x62   :  { %355 = vrot.lane.b32.xlu1 %v40_v21, %s1010_s1  ;;  %339 = vrot.lane.b32.xlu0 %v32_v22, %s1010_s1 }
  0x66   :  { %121 = vrot.lane.b32.xlu1 %v42_v29, %s1006_s13  ;;  %105 = vrot.lane.b32.xlu0 %v34_v30, %s1006_s13 }
  0x6a   :  { %231 = vrot.lane.b32.xlu1 %v41_v23, %s1008_s27  ;;  %215 = vrot.lane.b32.xlu0 %v33_v24, %s1008_s27 }
  0x6e   :  { %293 = vrot.lane.b32.xlu1 %v1210_v27, %s1009_s4  ;;  %277 = vrot.lane.b32.xlu0 %v1215_v28, %s1009_s4 }
  0x72   :  { %123 = vrot.lane.b32.xlu1 %v43_v31, %s1006_s13  ;;  %107 = vrot.lane.b32.xlu0 %v35_v32, %s1006_s13 }
  0x74   :  { %v1261_v35 = vpop.permute.xlu1 %95  ;;  %v94_v36 = vpop.permute.xlu0 %93 }
  0x75   :  { %v382_v59 = vsel %vm381_vm1, %v1058_v5, %v94_v36  ;;  %v383_v15 = vsel %vm381_vm1, %v1072_v7, %v1261_v35 }
  0x76   :  { %185 = vrot.lane.b32.xlu1 %v1254_v33, %s1007_s22  ;;  %169 = vrot.lane.b32.xlu0 %v1259_v34, %s1007_s22 }
  0x78   :  { %v1267_v37 = vpop.permute.xlu1 %111  ;;  %v110_v38 = vpop.permute.xlu0 %109 }
  0x79   :  { %v390_v60 = vsel %vm381_vm1, %v1053_v4, %v110_v38  ;;  %v391_v16 = vsel %vm381_vm1, %v1067_v6, %v1267_v37 }
  0x7a   :  { %295 = vrot.lane.b32.xlu1 %v1254_v33, %s1009_s4  ;;  %279 = vrot.lane.b32.xlu0 %v1259_v34, %s1009_s4 }
  0x7c   :  { %v174_v41 = vpop.permute.xlu1 %173  ;;  %v158_v42 = vpop.permute.xlu0 %157 }
  0x7d   :  { %v407_v63 = vsel %vm398_vm2, %v390_v60, %v174_v41  ;;  %v399_v0 = vsel %vm398_vm2, %v382_v59, %v158_v42 }
  0x7e   :  { %187 = vrot.lane.b32.xlu1 %v1276_v39, %s1007_s22  ;;  %171 = vrot.lane.b32.xlu0 %v1281_v40, %s1007_s22  ;;  %v424_v3 = vsel %vm415_vm3, %v407_v63, %v174_v41  ;;  %v416_v4 = vsel %vm415_vm3, %v399_v0, %v158_v42 }
  0x80   :  { %v1287_v43 = vpop.permute.xlu1 %175  ;;  %v1289_v44 = vpop.permute.xlu0 %159 }
  0x81   :  { %v408_v17 = vsel %vm398_vm2, %v391_v16, %v1287_v43  ;;  %v400_v18 = vsel %vm398_vm2, %v383_v15, %v1289_v44 }
  0x82   :  { %357 = vrot.lane.b32.xlu1 %v41_v23, %s1010_s1  ;;  %341 = vrot.lane.b32.xlu0 %v33_v24, %s1010_s1  ;;  %v425_v6 = vsel %vm415_vm3, %v408_v17, %v1287_v43 }
  0x84   :  { %v222_v45 = vpop.permute.xlu1 %221  ;;  %v206_v46 = vpop.permute.xlu0 %205 }
  0x85   :  { %v441_v5 = vsel %vm432_vm4, %v424_v3, %v222_v45  ;;  %v433_v8 = vsel %vm432_vm4, %v416_v4, %v206_v46 }
  0x86   :  { %233 = vrot.lane.b32.xlu1 %v42_v29, %s1008_s27  ;;  %217 = vrot.lane.b32.xlu0 %v34_v30, %s1008_s27 }
  0x88   :  { %v1295_v47 = vpop.permute.xlu1 %113  ;;  %v1297_v48 = vpop.permute.xlu0 %97 }
  0x89   :  { %v392_v63 = vsel %vm381_vm1, %v1116_v13, %v1295_v47  ;;  %v384_v0 = vsel %vm381_vm1, %v1121_v14, %v1297_v48 }
  0x8a   :  { %359 = vrot.lane.b32.xlu1 %v42_v29, %s1010_s1  ;;  %343 = vrot.lane.b32.xlu0 %v34_v30, %s1010_s1  ;;  %v417_v30 = vsel %vm415_vm3, %v400_v18, %v1289_v44 }
  0x8c   :  { %v224_v49 = vpop.permute.xlu1 %223  ;;  %v208_v50 = vpop.permute.xlu0 %207 }
  0x8e   :  { %235 = vrot.lane.b32.xlu1 %v43_v31, %s1008_s27  ;;  %219 = vrot.lane.b32.xlu0 %v35_v32, %s1008_s27 }
  0x90   :  { %v286_v51 = vpop.permute.xlu1 %285  ;;  %v270_v52 = vpop.permute.xlu0 %269 }
  0x91   :  { %v458_v11 = vsel %vm449_vm5, %v441_v5, %v286_v51  ;;  %v450_v12 = vsel %vm449_vm5, %v433_v8, %v270_v52 }
  0x92   :  { %297 = vrot.lane.b32.xlu1 %v1276_v39, %s1009_s4  ;;  %281 = vrot.lane.b32.xlu0 %v1281_v40, %s1009_s4  ;;  %v475_v21 = vsel %vm466_vm6, %v458_v11, %v286_v51  ;;  %v467_v22 = vsel %vm466_vm6, %v450_v12, %v270_v52 }
  0x94   :  { %v1313_v55 = vpop.permute.xlu1 %115  ;;  %v1315_v56 = vpop.permute.xlu0 %99 }
  0x95   :  { %v393_v15 = vsel %vm381_vm1, %v1146_v19, %v1313_v55 }
  0x96   :  { %299 = vrot.lane.b32.xlu1 %v874_v53, %s1009_s4  ;;  %283 = vrot.lane.b32.xlu0 %v866_v54, %s1009_s4 }
  0x98   :  { %v1319_v57 = vpop.permute.xlu1 %177  ;;  %v1321_v58 = vpop.permute.xlu0 %161 }
  0x9a   :  { %361 = vrot.lane.b32.xlu1 %v43_v31, %s1010_s1  ;;  %345 = vrot.lane.b32.xlu0 %v35_v32, %s1010_s1  ;;  %v442_v31 = vsel %vm432_vm4, %v425_v6, %v224_v49  ;;  %v434_v32 = vsel %vm432_vm4, %v417_v30, %v208_v50 }
  0x9c   :  { %v288_v1 = vpop.permute.xlu1 %287  ;;  %v272_v2 = vpop.permute.xlu0 %271 }
  0x9d   :  { %v459_v37 = vsel %vm449_vm5, %v442_v31, %v288_v1  ;;  %v451_v38 = vsel %vm449_vm5, %v434_v32, %v272_v2 }
  0x9e   :  { %363 = vrot.lane.b32.xlu1 %v890_v61, %s1010_s1  ;;  %347 = vrot.lane.b32.xlu0 %v882_v62, %s1010_s1  ;;  %v476_v41 = vsel %vm466_vm6, %v459_v37, %v288_v1  ;;  %v468_v42 = vsel %vm466_vm6, %v451_v38, %v272_v2  ;;  %v409_v1 = vsel %vm398_vm2, %v392_v63, %v1319_v57  ;;  %s848_s1 = sshll.u32 %s1011_s0, 4  ;;  %s849_s1 = int_to_ptr.vmem [resolvable:$true] %s848_s1 }
  0x9f   :  { %v401_v2 = vsel %vm398_vm2, %v384_v0, %v1321_v58  ;;  %v426_v5 = vsel %vm415_vm3, %v409_v1, %v1319_v57  ;;  %v385_v57 = vsel %vm381_vm1, %v1151_v20, %v1315_v56  ;;  %s984_s17 = scalar_lea.vmem %s849_s1, 2048  ;;  %p989_p1 = scmp.lt.s32.totalorder %s849_s1, %s849_s1 }
  0xa0   :  { %v1343_v9 = vpop.permute.xlu1 %179  ;;  %v1345_v10 = vpop.permute.xlu0 %163  ;;  %v418_v8 = vsel %vm415_vm3, %v401_v2, %v1321_v58  ;;  %p985_p0 = scmp.ne.s32.totalorder %s849_s1, %s984_s17  ;;  %p990_p2 = scmp.lt.s32.totalorder %s984_s17, %s984_s17 }
  0xa1   :  { %v410_v58 = vsel %vm398_vm2, %v393_v15, %v1343_v9  ;;  %v402_v16 = vsel %vm398_vm2, %v385_v57, %v1345_v10 }
  0xa2   :  { %v427_v20 = vsel %vm415_vm3, %v410_v58, %v1343_v9  ;;  %v419_v55 = vsel %vm415_vm3, %v402_v16, %v1345_v10  ;;  %p991_p3 = por %p990_p2, %p989_p1 }
  0xa4   :  { %v350_v23 = vpop.permute.xlu1 %349  ;;  %v334_v24 = vpop.permute.xlu0 %333  ;;  %p992_p4 = pnand %p991_p3, %p985_p0 }
  0xa5   :  { %v484_v29 = vsel %vm483_vm7, %v467_v22, %v334_v24  ;;  %v492_v7 = vsel %vm483_vm7, %v475_v21, %v350_v23 }
  0xa6   :  { %939 = vmatprep.mubr.msk.f32.mxu0 %vm505_vm8, %v484_v29  ;;  %951 = vmatprep.mubr.msk.f32.mxu1 %vm505_vm8, %v492_v7 }
  0xa8   :  { %v226_v35 = vpop.permute.xlu1 %225  ;;  %v210_v36 = vpop.permute.xlu0 %209 }
  0xa9   :  { %v443_v13 = vsel %vm432_vm4, %v426_v5, %v226_v35  ;;  %v435_v47 = vsel %vm432_vm4, %v418_v8, %v210_v36 }
  0xac   :  { %v352_v45 = vpop.permute.xlu1 %351  ;;  %v336_v46 = vpop.permute.xlu0 %335 }
  0xad   :  { %v493_v43 = vsel %vm483_vm7, %v476_v41, %v352_v45  ;;  %v485_v44 = vsel %vm483_vm7, %v468_v42, %v336_v46 }
  0xae   :  { %940 = vmatmul.mubr.msk.f32.vlgmr.msra.gmra.mxu0 %vm505_vm8, %v485_v44  ;;  %952 = vmatmul.mubr.msk.f32.vlgmr.msra.gmra.mxu1 %vm505_vm8, %v493_v43 }
  0xb0   :  { %v1379_v49 = vpop.permute.xlu1 %117  ;;  %v1381_v50 = vpop.permute.xlu0 %101 }
  0xb4   :  { %v228_v51 = vpop.permute.xlu1 %227  ;;  %v212_v52 = vpop.permute.xlu0 %211 }
  0xb5   :  { %v444_v56 = vsel %vm432_vm4, %v427_v20, %v228_v51  ;;  %v436_v24 = vsel %vm432_vm4, %v419_v55, %v212_v52 }
  0xb8   :  { %v290_v53 = vpop.permute.xlu1 %289  ;;  %v274_v54 = vpop.permute.xlu0 %273 }
  0xb9   :  { %v460_v48 = vsel %vm449_vm5, %v443_v13, %v290_v53  ;;  %v452_v12 = vsel %vm449_vm5, %v435_v47, %v274_v54 }
  0xba   :  { %v477_v17 = vsel %vm466_vm6, %v460_v48, %v290_v53  ;;  %v469_v18 = vsel %vm466_vm6, %v452_v12, %v274_v54  ;;  %v394_v53 = vsel %vm381_vm1, %v1192_v25, %v1379_v49  ;;  %v386_v54 = vsel %vm381_vm1, %v1197_v26, %v1381_v50 }
  0xbc   :  { %v1383_v59 = vpop.permute.xlu1 %119  ;;  %v1385_v60 = vpop.permute.xlu0 %103 }
  0xbd   :  { %v395_v50 = vsel %vm381_vm1, %v1210_v27, %v1383_v59 }
  0xc0   :  { %v182_v61 = vpop.permute.xlu1 %181  ;;  %v166_v62 = vpop.permute.xlu0 %165 }
  0xc1   :  { %v411_v63 = vsel %vm398_vm2, %v394_v53, %v182_v61  ;;  %v403_v0 = vsel %vm398_vm2, %v386_v54, %v166_v62 }
  0xc4   :  { %v292_v3 = vpop.permute.xlu1 %291  ;;  %v276_v4 = vpop.permute.xlu0 %275 }
  0xc5   :  { %v461_v6 = vsel %vm449_vm5, %v444_v56, %v292_v3  ;;  %v453_v30 = vsel %vm449_vm5, %v436_v24, %v276_v4 }
  0xc6   :  { %v478_v31 = vsel %vm466_vm6, %v461_v6, %v292_v3  ;;  %v470_v32 = vsel %vm466_vm6, %v453_v30, %v276_v4  ;;  %v428_v3 = vsel %vm415_vm3, %v411_v63, %v182_v61  ;;  %v420_v4 = vsel %vm415_vm3, %v403_v0, %v166_v62 }
  0xc7   :  { %v387_v61 = vsel %vm381_vm1, %v1215_v28, %v1385_v60 }
  0xc8   :  { %v1403_v11 = vpop.permute.xlu1 %183  ;;  %v1405_v14 = vpop.permute.xlu0 %167 }
  0xc9   :  { %v412_v62 = vsel %vm398_vm2, %v395_v50, %v1403_v11  ;;  %v404_v47 = vsel %vm398_vm2, %v387_v61, %v1405_v14 }
  0xca   :  { %v429_v28 = vsel %vm415_vm3, %v412_v62, %v1403_v11  ;;  %v421_v59 = vsel %vm415_vm3, %v404_v47, %v1405_v14 }
  0xcc   :  { %v354_v21 = vpop.permute.xlu1 %353  ;;  %v338_v22 = vpop.permute.xlu0 %337 }
  0xcd   :  { %v494_v23 = vsel %vm483_vm7, %v477_v17, %v354_v21  ;;  %v486_v19 = vsel %vm483_vm7, %v469_v18, %v338_v22 }
  0xce   :  { %942 = vmatprep.mubr.msk.f32.mxu0 %vm505_vm8, %v486_v19  ;;  %954 = vmatprep.mubr.msk.f32.mxu1 %vm505_vm8, %v494_v23 }
  0xd0   :  { %v230_v29 = vpop.permute.xlu1 %229  ;;  %v214_v7 = vpop.permute.xlu0 %213 }
  0xd1   :  { %v445_v5 = vsel %vm432_vm4, %v428_v3, %v230_v29  ;;  %v437_v8 = vsel %vm432_vm4, %v420_v4, %v214_v7 }
  0xd4   :  { %v356_v35 = vpop.permute.xlu1 %355  ;;  %v340_v36 = vpop.permute.xlu0 %339 }
  0xd5   :  { %v495_v9 = vsel %vm483_vm7, %v478_v31, %v356_v35  ;;  %v487_v10 = vsel %vm483_vm7, %v470_v32, %v340_v36 }
  0xd6   :  { %943 = vmatmul.mubr.msk.f32.gmra.mxu0 %vm505_vm8, %v487_v10  ;;  %955 = vmatmul.mubr.msk.f32.gmra.mxu1 %vm505_vm8, %v495_v9 }
  0xd8   :  { %v122_v37 = vpop.permute.xlu1 %121  ;;  %v106_v38 = vpop.permute.xlu0 %105 }
  0xd9   :  { %v396_v29 = vsel %vm381_vm1, %v1254_v33, %v122_v37  ;;  %v388_v7 = vsel %vm381_vm1, %v1259_v34, %v106_v38 }
  0xdc   :  { %v232_v41 = vpop.permute.xlu1 %231  ;;  %v216_v42 = vpop.permute.xlu0 %215 }
  0xdd   :  { %v446_v60 = vsel %vm432_vm4, %v429_v28, %v232_v41  ;;  %v438_v16 = vsel %vm432_vm4, %v421_v59, %v216_v42 }
  0xe0   :  { %v294_v45 = vpop.permute.xlu1 %293  ;;  %v278_v46 = vpop.permute.xlu0 %277 }
  0xe1   :  { %v462_v49 = vsel %vm449_vm5, %v445_v5, %v294_v45  ;;  %v454_v26 = vsel %vm449_vm5, %v437_v8, %v278_v46 }
  0xe2   :  { %v479_v48 = vsel %vm466_vm6, %v462_v49, %v294_v45  ;;  %v471_v12 = vsel %vm466_vm6, %v454_v26, %v278_v46 }
  0xe4   :  { %v124_v43 = vpop.permute.xlu1 %123  ;;  %v108_v44 = vpop.permute.xlu0 %107 }
  0xe5   :  { %v397_v35 = vsel %vm381_vm1, %v1276_v39, %v124_v43  ;;  %v389_v36 = vsel %vm381_vm1, %v1281_v40, %v108_v44 }
  0xe8   :  { %v186_v51 = vpop.permute.xlu1 %185  ;;  %v170_v52 = vpop.permute.xlu0 %169 }
  0xe9   :  { %v413_v6 = vsel %vm398_vm2, %v396_v29, %v186_v51  ;;  %v405_v30 = vsel %vm398_vm2, %v388_v7, %v170_v52 }
  0xea   :  { %v430_v9 = vsel %vm415_vm3, %v413_v6, %v186_v51  ;;  %v422_v10 = vsel %vm415_vm3, %v405_v30, %v170_v52 }
  0xec   :  { %v296_v1 = vpop.permute.xlu1 %295  ;;  %v280_v2 = vpop.permute.xlu0 %279 }
  0xed   :  { %v463_v21 = vsel %vm449_vm5, %v446_v60, %v296_v1  ;;  %v455_v22 = vsel %vm449_vm5, %v438_v16, %v280_v2 }
  0xee   :  { %v480_v23 = vsel %vm466_vm6, %v463_v21, %v296_v1  ;;  %v472_v19 = vsel %vm466_vm6, %v455_v22, %v280_v2 }
  0xf0   :  { %v188_v13 = vpop.permute.xlu1 %187  ;;  %v172_v25 = vpop.permute.xlu0 %171 }
  0xf1   :  { %v414_v33 = vsel %vm398_vm2, %v397_v35, %v188_v13  ;;  %v406_v34 = vsel %vm398_vm2, %v389_v36, %v172_v25 }
  0xf2   :  { %v431_v40 = vsel %vm415_vm3, %v414_v33, %v188_v13  ;;  %v423_v46 = vsel %vm415_vm3, %v406_v34, %v172_v25 }
  0xf4   :  { %v358_v15 = vpop.permute.xlu1 %357  ;;  %v342_v57 = vpop.permute.xlu0 %341 }
  0xf5   :  { %v496_v58 = vsel %vm483_vm7, %v479_v48, %v358_v15  ;;  %v488_v27 = vsel %vm483_vm7, %v471_v12, %v342_v57 }
  0xf6   :  { %945 = vmatprep.mubr.msk.f32.mxu0 %vm505_vm8, %v488_v27  ;;  %957 = vmatprep.mubr.msk.f32.mxu1 %vm505_vm8, %v496_v58 }
  0xf8   :  { %v234_v17 = vpop.permute.xlu1 %233  ;;  %v218_v18 = vpop.permute.xlu0 %217 }
  0xf9   :  { %v447_v37 = vsel %vm432_vm4, %v430_v9, %v234_v17  ;;  %v439_v38 = vsel %vm432_vm4, %v422_v10, %v218_v18 }
  0xfc   :  { %v360_v20 = vpop.permute.xlu1 %359  ;;  %v344_v55 = vpop.permute.xlu0 %343 }
  0xfd   :  { %v497_v11 = vsel %vm483_vm7, %v480_v23, %v360_v20  ;;  %v489_v14 = vsel %vm483_vm7, %v472_v19, %v344_v55 }
  0xfe   :  { %946 = vmatmul.mubr.msk.f32.gmra.mxu0 %vm505_vm8, %v489_v14  ;;  %958 = vmatmul.mubr.msk.f32.gmra.mxu1 %vm505_vm8, %v497_v11 }
 0x100   :  { %v236_v56 = vpop.permute.xlu1 %235  ;;  %v220_v24 = vpop.permute.xlu0 %219 }
 0x101   :  { %v448_v43 = vsel %vm432_vm4, %v431_v40, %v236_v56  ;;  %v440_v44 = vsel %vm432_vm4, %v423_v46, %v220_v24 }
 0x104   :  { %v298_v31 = vpop.permute.xlu1 %297  ;;  %v282_v32 = vpop.permute.xlu0 %281 }
 0x105   :  { %v464_v45 = vsel %vm449_vm5, %v447_v37, %v298_v31  ;;  %v456_v39 = vsel %vm449_vm5, %v439_v38, %v282_v32 }
 0x106   :  { %v481_v51 = vsel %vm466_vm6, %v464_v45, %v298_v31  ;;  %v473_v52 = vsel %vm466_vm6, %v456_v39, %v282_v32 }
 0x108   :  { %v300_v41 = vpop.permute.xlu1 %299  ;;  %v284_v42 = vpop.permute.xlu0 %283 }
 0x109   :  { %v465_v63 = vsel %vm449_vm5, %v448_v43, %v300_v41  ;;  %v457_v0 = vsel %vm449_vm5, %v440_v44, %v284_v42 }
 0x10a   :  { %v482_v3 = vsel %vm466_vm6, %v465_v63, %v300_v41  ;;  %v474_v4 = vsel %vm466_vm6, %v457_v0, %v284_v42 }
 0x10c   :  { %v362_v53 = vpop.permute.xlu1 %361  ;;  %v346_v54 = vpop.permute.xlu0 %345 }
 0x10d   :  { %v498_v1 = vsel %vm483_vm7, %v481_v51, %v362_v53  ;;  %v490_v2 = vsel %vm483_vm7, %v473_v52, %v346_v54 }
 0x10e   :  { %948 = vmatprep.mubr.msk.f32.mxu0 %vm505_vm8, %v490_v2  ;;  %960 = vmatprep.mubr.msk.f32.mxu1 %vm505_vm8, %v498_v1 }
 0x110   :  { %v364_v5 = vpop.permute.xlu1 %363  ;;  %v348_v8 = vpop.permute.xlu0 %347 }
 0x111   :  { %v499_v13 = vsel %vm483_vm7, %v482_v3, %v364_v5  ;;  %v491_v25 = vsel %vm483_vm7, %v474_v4, %v348_v8 }
 0x112   :  { %949 = vmatmul.mubr.msk.f32.gmra.mxu0 %vm505_vm8, %v491_v25  ;;  %961 = vmatmul.mubr.msk.f32.gmra.mxu1 %vm505_vm8, %v499_v13 }
 0x16e   :  { %v941_v49 = vpop.f32.mrf.mxu0  ;;  %v953_v26 = vpop.f32.mrf.mxu1 }
 0x170   :  { %v624_v50 = vpop.f32.mrf.mxu0  ;;  %v664_v61 = vpop.f32.mrf.mxu1 }
 0x171   :  { %v703_v15 = vadd.f32 %v941_v49, %v624_v50  ;;  %v716_v57 = vadd.f32 %v953_v26, %v664_v61 }
 0x196   :  { %v944_v62 = vpop.f32.mrf.mxu0  ;;  %v956_v47 = vpop.f32.mrf.mxu1 }
 0x198   :  { %v634_v48 = vpop.f32.mrf.mxu0  ;;  %v674_v12 = vpop.f32.mrf.mxu1 }
 0x199   :  { %v704_v28 = vadd.f32 %v703_v15, %v634_v48  ;;  %v717_v59 = vadd.f32 %v716_v57, %v674_v12 }
 0x19b   :  { %v705_v17 = vadd.f32 %v944_v62, %v704_v28  ;;  %v718_v18 = vadd.f32 %v956_v47, %v717_v59 }
 0x1be   :  { %v947_v58 = vpop.f32.mrf.mxu0  ;;  %v959_v27 = vpop.f32.mrf.mxu1 }
 0x1c0   :  { %v644_v60 = vpop.f32.mrf.mxu0  ;;  %v684_v16 = vpop.f32.mrf.mxu1 }
 0x1c1   :  { %v706_v21 = vadd.f32 %v705_v17, %v644_v60  ;;  %v719_v22 = vadd.f32 %v718_v18, %v684_v16 }
 0x1c3   :  { %v707_v20 = vadd.f32 %v947_v58, %v706_v21  ;;  %v720_v55 = vadd.f32 %v959_v27, %v719_v22 }
 0x1d2   :  { %v950_v23 = vpop.f32.mrf.mxu0  ;;  %v962_v19 = vpop.f32.mrf.mxu1 }
 0x1d4   :  { %v654_v11 = vpop.f32.mrf.mxu0  ;;  %v694_v14 = vpop.f32.mrf.mxu1 }
 0x1d5   :  { %v708_v56 = vadd.f32 %v707_v20, %v654_v11  ;;  %v721_v24 = vadd.f32 %v720_v55, %v694_v14 }
 0x1d7   :  { %v709_v29 = vadd.f32 %v950_v23, %v708_v56  ;;  %v722_v7 = vadd.f32 %v962_v19, %v721_v24 }
 0x1d9   :  { %v710_v6 = vrot.slane %v709_v29, 4  ;;  %v723_v30 = vrot.slane %v722_v7, 4 }
 0x1db   :  { %v711_v31 = vadd.f32 %v710_v6, %v709_v29  ;;  %v724_v32 = vadd.f32 %v723_v30, %v722_v7 }
 0x1dd   :  { %v712_v35 = vrot.slane %v711_v31, 2  ;;  %v725_v36 = vrot.slane %v724_v32, 2 }
 0x1df   :  { %v713_v9 = vadd.f32 %v712_v35, %v711_v31  ;;  %v726_v10 = vadd.f32 %v725_v36, %v724_v32 }
 0x1e1   :  { %v714_v33 = vrot.slane %v713_v9, 1  ;;  %v727_v34 = vrot.slane %v726_v10, 1 }
 0x1e3   :  { %v715_v37 = vadd.f32 %v714_v33, %v713_v9  ;;  %v728_v38 = vadd.f32 %v727_v34, %v726_v10 }
 0x1e5   :  { %v729_v41 = vmul.f32 0.015625, %v715_v37  ;;  %v730_v40 = vmul.f32 0.015625, %v728_v38 }
 0x1e7   :  { %v1519_v42 = vsub.f32 %v624_v50, %v729_v41  ;;  %v1521_v45 = vsub.f32 %v941_v49, %v729_v41  ;;  %v1523_v39 = vsub.f32 %v634_v48, %v729_v41  ;;  %v1525_v46 = vsub.f32 %v944_v62, %v729_v41 }
 0x1e8   :  { %v1531_v51 = vsub.f32 %v644_v60, %v729_v41  ;;  %v1535_v54 = vsub.f32 %v664_v61, %v730_v40  ;;  %v1537_v63 = vsub.f32 %v953_v26, %v730_v40  ;;  %v1539_v0 = vsub.f32 %v674_v12, %v730_v40 }
 0x1e9   :  { %v747_v43 = vmul.f32 %v1519_v42, %v1519_v42  ;;  %v748_v44 = vmul.f32 %v1521_v45, %v1521_v45  ;;  %v749_v52 = vmul.f32 %v1523_v39, %v1523_v39  ;;  %v736_v1 = vsub.f32 %v947_v58, %v729_v41 }
 0x1ea   :  { %v750_v2 = vmul.f32 %v1525_v46, %v1525_v46  ;;  %v1543_v4 = vsub.f32 %v956_v47, %v730_v40  ;;  %v755_v5 = vmul.f32 %v1535_v54, %v1535_v54  ;;  %v756_v8 = vmul.f32 %v1537_v63, %v1537_v63 }
 0x1eb   :  { %v763_v53 = vadd.f32 %v748_v44, %v747_v43  ;;  %v737_v13 = vsub.f32 %v654_v11, %v729_v41  ;;  %v751_v25 = vmul.f32 %v1531_v51, %v1531_v51  ;;  %v1551_v26 = vsub.f32 %v684_v16, %v730_v40 }
 0x1ec   :  { %v757_v50 = vmul.f32 %v1539_v0, %v1539_v0  ;;  %v776_v61 = vadd.f32 %v756_v8, %v755_v5  ;;  %v738_v62 = vsub.f32 %v950_v23, %v729_v41  ;;  %v752_v47 = vmul.f32 %v736_v1, %v736_v1 }
 0x1ed   :  { %v764_v3 = vadd.f32 %v763_v53, %v749_v52  ;;  %v1555_v12 = vsub.f32 %v959_v27, %v730_v40  ;;  %v758_v15 = vmul.f32 %v1543_v4, %v1543_v4  ;;  %v753_v58 = vmul.f32 %v737_v13, %v737_v13 }
 0x1ee   :  { %v777_v57 = vadd.f32 %v776_v61, %v757_v50  ;;  %v1559_v59 = vsub.f32 %v694_v14, %v730_v40  ;;  %v759_v60 = vmul.f32 %v1551_v26, %v1551_v26  ;;  %v754_v17 = vmul.f32 %v738_v62, %v738_v62 }
 0x1ef   :  { %v765_v49 = vadd.f32 %v764_v3, %v750_v2  ;;  %v746_v21 = vsub.f32 %v962_v19, %v730_v40  ;;  %v760_v22 = vmul.f32 %v1555_v12, %v1555_v12 }
 0x1f0   :  { %v778_v16 = vadd.f32 %v777_v57, %v758_v15  ;;  %v761_v20 = vmul.f32 %v1559_v59, %v1559_v59 }
 0x1f1   :  { %v766_v48 = vadd.f32 %v765_v49, %v751_v25  ;;  %v762_v56 = vmul.f32 %v746_v21, %v746_v21 }
 0x1f2   :  { %v779_v27 = vadd.f32 %v778_v16, %v759_v60 }
 0x1f3   :  { %v767_v28 = vadd.f32 %v766_v48, %v752_v47 }
 0x1f4   :  { %v780_v55 = vadd.f32 %v779_v27, %v760_v22 }
 0x1f5   :  { %v768_v18 = vadd.f32 %v767_v28, %v753_v58 }
 0x1f6   :  { %v781_v14 = vadd.f32 %v780_v55, %v761_v20 }
 0x1f7   :  { %v769_v23 = vadd.f32 %v768_v18, %v754_v17 }
 0x1f8   :  { %v782_v29 = vadd.f32 %v781_v14, %v762_v56 }
 0x1f9   :  { %v770_v11 = vrot.slane %v769_v23, 4 }
 0x1fa   :  { %v783_v6 = vrot.slane %v782_v29, 4 }
 0x1fb   :  { %v771_v24 = vadd.f32 %v770_v11, %v769_v23 }
 0x1fc   :  { %v784_v31 = vadd.f32 %v783_v6, %v782_v29 }
 0x1fd   :  { %v772_v7 = vrot.slane %v771_v24, 2 }
 0x1fe   :  { %v785_v19 = vrot.slane %v784_v31, 2 }
 0x1ff   :  { %v773_v30 = vadd.f32 %v772_v7, %v771_v24 }
 0x200   :  { %v786_v36 = vadd.f32 %v785_v19, %v784_v31 }
 0x201   :  { %v774_v32 = vrot.slane %v773_v30, 1 }
 0x202   :  { %v787_v10 = vrot.slane %v786_v36, 1 }
 0x203   :  { %v775_v35 = vadd.f32 %v774_v32, %v773_v30 }
 0x204   :  { %v788_v34 = vadd.f32 %v787_v10, %v786_v36 }
 0x205   :  { %v789_v9 = vmul.f32 0.015625, %v775_v35 }
 0x206   :  { %v790_v37 = vmul.f32 0.015625, %v788_v34 }
 0x207   :  { %v791_v33 = vadd.f32 1e-05, %v789_v9 }
 0x208   :  { %v792_v38 = vadd.f32 1e-05, %v790_v37 }
 0x209   :  { %980 = vrsqrt.f32 %v791_v33 }
 0x20a   :  { %982 = vrsqrt.f32 %v792_v38 }
 0x216   :  { %v981_v41 = vpop.eup %980 }
 0x217   :  { %v795_v40 = vmul.f32 %v981_v41, %v1519_v42  ;;  %v796_v43 = vmul.f32 %v981_v41, %v1521_v45  ;;  %v797_v44 = vmul.f32 %v981_v41, %v1523_v39  ;;  %v798_v52 = vmul.f32 %v981_v41, %v1525_v46  ;;  %v983_v61 = vpop.eup %982 }
 0x218   :  { %v799_v53 = vmul.f32 %v981_v41, %v1531_v51  ;;  %v800_v2 = vmul.f32 %v981_v41, %v736_v1  ;;  %v801_v3 = vmul.f32 %v981_v41, %v737_v13  ;;  %v802_v5 = vmul.f32 %v981_v41, %v738_v62 }
 0x219   :  { %v811_v8 = vmax.f32 %v795_v40, 0.0  ;;  %v812_v25 = vmax.f32 %v796_v43, 0.0  ;;  %v813_v49 = vmax.f32 %v797_v44, 0.0  ;;  %v814_v50 = vmax.f32 %v798_v52, 0.0 }
 0x21a   :  { %v815_v47 = vmax.f32 %v799_v53, 0.0  ;;  %v816_v48 = vmax.f32 %v800_v2, 0.0  ;;  %v817_v15 = vmax.f32 %v801_v3, 0.0  ;;  %v818_v42 = vmax.f32 %v802_v5, 0.0 }
 0x21b   :  { %827 = vst [vmem:[#allocation2] sm:$0xff] %v811_v8  ;;  %828 = vst [vmem:[#allocation2 + $0x8] sm:$0xff] %v812_v25  ;;  %v803_v45 = vmul.f32 %v983_v61, %v1535_v54  ;;  %v804_v39 = vmul.f32 %v983_v61, %v1537_v63  ;;  %v805_v46 = vmul.f32 %v983_v61, %v1539_v0 }
 0x21c   :  { %829 = vst [vmem:[#allocation2 + $0x10] sm:$0xff] %v813_v49  ;;  %830 = vst [vmem:[#allocation2 + $0x18] sm:$0xff] %v814_v50  ;;  %v806_v51 = vmul.f32 %v983_v61, %v1543_v4  ;;  %v807_v1 = vmul.f32 %v983_v61, %v1551_v26  ;;  %v808_v13 = vmul.f32 %v983_v61, %v1555_v12 }
 0x21d   :  { %831 = vst [vmem:[#allocation2 + $0x20] sm:$0xff] %v815_v47  ;;  %832 = vst [vmem:[#allocation2 + $0x28] sm:$0xff] %v816_v48  ;;  %v809_v62 = vmul.f32 %v983_v61, %v1559_v59  ;;  %v810_v57 = vmul.f32 %v983_v61, %v746_v21  ;;  %v819_v54 = vmax.f32 %v803_v45, 0.0  ;;  %v820_v58 = vmax.f32 %v804_v39, 0.0 }
 0x21e   :  { %833 = vst [vmem:[#allocation2 + $0x30] sm:$0xff] %v817_v15  ;;  %834 = vst [vmem:[#allocation2 + $0x38] sm:$0xff] %v818_v42  ;;  %v821_v63 = vmax.f32 %v805_v46, 0.0  ;;  %v822_v28 = vmax.f32 %v806_v51, 0.0  ;;  %v823_v0 = vmax.f32 %v807_v1, 0.0  ;;  %v824_v60 = vmax.f32 %v808_v13, 0.0 }
 0x21f   :  { %v825_v4 = vmax.f32 %v809_v62, 0.0  ;;  %v826_v16 = vmax.f32 %v810_v57, 0.0  ;;  %835 = vst [vmem:[#allocation2 + $0x40] sm:$0xff] %v819_v54  ;;  %836 = vst [vmem:[#allocation2 + $0x48] sm:$0xff] %v820_v58 }
 0x220   :  { %837 = vst [vmem:[#allocation2 + $0x50] sm:$0xff] %v821_v63  ;;  %838 = vst [vmem:[#allocation2 + $0x58] sm:$0xff] %v822_v28 }
 0x221   :  { %839 = vst [vmem:[#allocation2 + $0x60] sm:$0xff] %v823_v0  ;;  %840 = vst [vmem:[#allocation2 + $0x68] sm:$0xff] %v824_v60 }
 0x222   :  { %841 = vst [vmem:[#allocation2 + $0x70] sm:$0xff] %v825_v4  ;;  %842 = vst [vmem:[#allocation2 + $0x78] sm:$0xff] %v826_v16 }
 0x223   :  { %995 = shalt.err (!%p992_p4)
}
 0x224   :  { %s1012_s18 = smov 128  }
 0x225   :  { %854 = dma.vmem_to_hbm [thread:$0]  %s849_s1, 2048, %s1585_s2, [#allocation3], %s1012_s18, %s1012_s18, %s1006_s13  }
 0x226   :  { %1004 = dma.done.wait [#allocation3], 2048  }
 0x227   :  { %1005 = vsyncadd [#allocation3], 4294965248 }
 0x228   :  { %858 = vsyncpa [#allocation3], 1 }

</bundles_post_ra>
